<compile_context>
chip_gen: v7x
topology: tpu7x:2x2x1
jax: 0.10.0
libtpu: 0.0.40
codegen_flags: <defaults>
</compile_context>

<pallas_src>
import math
import functools

import jax
import jax.numpy as jnp
from jax.experimental import pallas as pl
from jax.experimental.pallas import tpu as pltpu


def _mha_kernel(q_ref, k_ref, v_ref,
                wq_ref, bq_ref, wk_ref, bk_ref, wv_ref, bv_ref,
                wo_ref, bo_ref, out_ref, *, h, d_k, bb, seq):
    f32 = jnp.float32
    cdt = q_ref.dtype  # compute dtype for MXU operands (bf16)

    # Wide [rows, D] x [D, D] projections over ALL bb*seq rows of this block:
    # bf16 operands, f32 accumulation.  The 1/sqrt(d_k) attention scale was
    # pre-folded into wq/bq by the wrapper.
    qp = jnp.dot(q_ref[...], wq_ref[...], preferred_element_type=f32) + bq_ref[...]
    kp = jnp.dot(k_ref[...], wk_ref[...], preferred_element_type=f32) + bk_ref[...]
    vp = jnp.dot(v_ref[...], wv_ref[...], preferred_element_type=f32) + bv_ref[...]

    # Attention per batch element (bb and h are small & static -> unrolled).
    ctx_rows = []
    for b in range(bb):
        r0 = b * seq
        qb = qp[r0:r0 + seq, :]                           # [S, D] (sublane slice)
        kb = kp[r0:r0 + seq, :]
        vb = vp[r0:r0 + seq, :]

        head_ctx = []
        for hd in range(h):
            c0 = hd * d_k
            qh = qb[:, c0:c0 + d_k].astype(cdt)           # [S, d_k]
            kh = kb[:, c0:c0 + d_k].astype(cdt)           # [S, d_k]
            vh = vb[:, c0:c0 + d_k].astype(cdt)           # [S, d_k]

            # scores = qh @ kh^T without materializing a transpose.
            s = jax.lax.dot_general(
                qh, kh, (((1,), (1,)), ((), ())),
                preferred_element_type=f32)               # [S, S]

            s = s - jnp.max(s, axis=-1, keepdims=True)
            p = jnp.exp(s)
            p = p / jnp.sum(p, axis=-1, keepdims=True)    # exact reciprocal

            head_ctx.append(jnp.dot(p.astype(cdt), vh,
                                    preferred_element_type=f32))  # [S, d_k]

        # Merge heads along lanes -> [S, D] (head order matches the PyTorch
        # transpose/view merge).
        ctx_rows.append(jnp.concatenate(head_ctx, axis=-1))

    # All rows of this block, merged heads: [rows, D].
    ctx = jnp.concatenate(ctx_rows, axis=0)

    # Single full-depth output projection: [rows, D] x [D, d_out] on the MXU.
    out = jnp.dot(ctx.astype(cdt), wo_ref[...],
                  preferred_element_type=f32) + bo_ref[...]
    out_ref[...] = out.astype(out_ref.dtype)


def _pick_batch_block(B, S, target_rows=128, max_rows=512):
    """Largest divisor of B whose row count bb*S stays <= max_rows, preferring
    >= target_rows; keeps bb*S a multiple of 8 unless the block covers all B."""
    best = None
    for cand in range(1, B + 1):
        if B % cand:
            continue
        rows = cand * S
        if rows > max_rows and best is not None:
            break
        if cand != B and rows % 8 != 0:
            continue
        best = cand
        if rows >= target_rows:
            break
    return best if best is not None else B


def _vmem_limit_bytes():
    # Per-generation scoped VMEM: ~3/4 of physical capacity, capped at 100 MiB
    # (v5e/v6e have 128 MiB; v7x has 64 MiB -> ~48 MiB limit).
    try:
        cap = pltpu.get_tpu_info().vmem_capacity_bytes
    except Exception:
        cap = 64 * 1024 * 1024
    return min(int(cap) * 3 // 4, 100 * 1024 * 1024)


def multi_headed_attention(query, key, value, params, h, *,
                           compute_dtype=jnp.bfloat16):
    """query/key/value: [B, S, D]; params: dict of projection weights."""
    B, S, D = query.shape
    assert D % h == 0
    d_k = D // h
    d_out = params["w_o"].shape[1]
    out_dtype = query.dtype

    # Fold 1/sqrt(d_k) into the query projection (trace time, outside kernel)
    # and cast all MXU operands to bf16; biases stay f32 (added post-matmul).
    scale = 1.0 / math.sqrt(d_k)
    wq = (params["w_q"] * scale).astype(compute_dtype)
    bq = (params["b_q"] * scale).astype(jnp.float32)
    wk = params["w_k"].astype(compute_dtype)
    bk = params["b_k"].astype(jnp.float32)
    wv = params["w_v"].astype(compute_dtype)
    bv = params["b_v"].astype(jnp.float32)
    wo = params["w_o"].astype(compute_dtype)
    bo = params["b_o"].astype(jnp.float32)

    # Flatten batch & seq into rows so projections see bb*S rows per grid step
    # and the output store is a single lane-dense slab.
    q2 = query.reshape(B * S, D).astype(compute_dtype)
    k2 = key.reshape(B * S, D).astype(compute_dtype)
    v2 = value.reshape(B * S, D).astype(compute_dtype)

    bb = _pick_batch_block(B, S)
    rows = bb * S
    grid = (B // bb,)

    kernel = functools.partial(_mha_kernel, h=h, d_k=d_k, bb=bb, seq=S)

    row_spec = pl.BlockSpec((rows, D), lambda i: (i, 0))
    w_spec = pl.BlockSpec((D, D), lambda i: (0, 0))
    b_spec = pl.BlockSpec((1, D), lambda i: (0, 0))
    wo_spec = pl.BlockSpec((D, d_out), lambda i: (0, 0))
    bo_spec = pl.BlockSpec((1, d_out), lambda i: (0, 0))
    out_spec = pl.BlockSpec((rows, d_out), lambda i: (i, 0))

    out2 = pl.pallas_call(
        kernel,
        out_shape=jax.ShapeDtypeStruct((B * S, d_out), out_dtype),
        grid_spec=pltpu.PrefetchScalarGridSpec(
            num_scalar_prefetch=0,
            grid=grid,
            in_specs=[
                row_spec, row_spec, row_spec,    # query, key, value rows
                w_spec, b_spec,                  # W_q (pre-scaled), b_q
                w_spec, b_spec,                  # W_k, b_k
                w_spec, b_spec,                  # W_v, b_v
                wo_spec, bo_spec,                # W_o, b_o
            ],
            out_specs=out_spec,
        ),
        compiler_params=pltpu.CompilerParams(
            dimension_semantics=("parallel",),
            vmem_limit_bytes=_vmem_limit_bytes(),
        ),
    )(q2, k2, v2, wq, bq, wk, bk, wv, bv, wo, bo)

    return out2.reshape(B, S, d_out)


def _reference(query, key, value, params, h):
    B, S, D = query.shape
    d_k = D // h
    qp = query @ params["w_q"] + params["b_q"]
    kp = key @ params["w_k"] + params["b_k"]
    vp = value @ params["w_v"] + params["b_v"]

    def split(x):
        return x.reshape(B, S, h, d_k).transpose(0, 2, 1, 3)

    qh, kh, vh = split(qp), split(kp), split(vp)
    scores = jnp.einsum("bhqd,bhkd->bhqk", qh, kh) / math.sqrt(d_k)
    p = jax.nn.softmax(scores, axis=-1)
    ctx = jnp.einsum("bhqk,bhkd->bhqd", p, vh)
    ctx = ctx.transpose(0, 2, 1, 3).reshape(B, S, D)
    return ctx @ params["w_o"] + params["b_o"]


def _init_params(key, d_model, d_output):
    ks = jax.random.split(key, 9)
    std_in = math.sqrt(2.0 / (d_model + d_model))
    std_out = math.sqrt(2.0 / (d_model + d_output))
    p = {
        "w_q": std_in * jax.random.normal(ks[0], (d_model, d_model), jnp.float32),
        "b_q": 0.01 * jax.random.normal(ks[1], (1, d_model), jnp.float32),
        "w_k": std_in * jax.random.normal(ks[2], (d_model, d_model), jnp.float32),
        "b_k": 0.01 * jax.random.normal(ks[3], (1, d_model), jnp.float32),
        "w_v": std_in * jax.random.normal(ks[4], (d_model, d_model), jnp.float32),
        "b_v": 0.01 * jax.random.normal(ks[5], (1, d_model), jnp.float32),
        "w_o": std_out * jax.random.normal(ks[6], (d_model, d_output), jnp.float32),
        "b_o": 0.01 * jax.random.normal(ks[7], (1, d_output), jnp.float32),
    }
    return p, ks[8]


if __name__ == "__main__":
    B, S, D, H, D_OUT = 2, 8, 32, 4, 64    # batch, seq, d_model, heads, d_output

    root = jax.random.PRNGKey(0)
    params, kx = _init_params(root, D, D_OUT)

    kq, kk, kv = jax.random.split(kx, 3)
    query = jax.random.normal(kq, (B, S, D), jnp.float32)
    key_in = jax.random.normal(kk, (B, S, D), jnp.float32)
    value = jax.random.normal(kv, (B, S, D), jnp.float32)

    out = multi_headed_attention(query, key_in, value, params, H)
    out = jax.block_until_ready(out)

    ref = _reference(query, key_in, value, params, H)
    assert out.shape == (B, S, D_OUT)
    # bf16 MXU operands (f32 accumulation) vs an all-f32 reference ->
    # tolerance at the bf16 rounding level.
    assert jnp.allclose(out, ref, atol=3e-2, rtol=3e-2), "mismatch vs reference"

    print("KERNEL_OK")
</pallas_src>

<mosaic_0001>
module attributes {stable_mosaic.version = 11 : i64} {
  func.func @_mha_kernel(%arg0: i32, %arg1: memref<16x32xbf16, #tpu.memory_space<vmem>>, %arg2: memref<16x32xbf16, #tpu.memory_space<vmem>>, %arg3: memref<16x32xbf16, #tpu.memory_space<vmem>>, %arg4: memref<32x32xbf16, #tpu.memory_space<vmem>>, %arg5: memref<1x32xf32, #tpu.memory_space<vmem>>, %arg6: memref<32x32xbf16, #tpu.memory_space<vmem>>, %arg7: memref<1x32xf32, #tpu.memory_space<vmem>>, %arg8: memref<32x32xbf16, #tpu.memory_space<vmem>>, %arg9: memref<1x32xf32, #tpu.memory_space<vmem>>, %arg10: memref<32x64xbf16, #tpu.memory_space<vmem>>, %arg11: memref<1x64xf32, #tpu.memory_space<vmem>>, %arg12: memref<16x64xf32, #tpu.memory_space<vmem>>) attributes {dimension_semantics = [#tpu.dimension_semantics<parallel>], iteration_bounds = array<i64: 1>, scalar_prefetch = 0 : i64, scratch_operands = 0 : i64, tpu.core_type = #tpu.core_type<tc>, window_params = [{transform_indices = @transform_0, window_bounds = array<i64: 16, 32>}, {transform_indices = @transform_1, window_bounds = array<i64: 16, 32>}, {transform_indices = @transform_2, window_bounds = array<i64: 16, 32>}, {pipeline_mode = #tpu.pipeline_mode<synchronous>, transform_indices = @transform_3, window_bounds = array<i64: 32, 32>}, {pipeline_mode = #tpu.pipeline_mode<synchronous>, transform_indices = @transform_4, window_bounds = array<i64: 1, 32>}, {pipeline_mode = #tpu.pipeline_mode<synchronous>, transform_indices = @transform_5, window_bounds = array<i64: 32, 32>}, {pipeline_mode = #tpu.pipeline_mode<synchronous>, transform_indices = @transform_6, window_bounds = array<i64: 1, 32>}, {pipeline_mode = #tpu.pipeline_mode<synchronous>, transform_indices = @transform_7, window_bounds = array<i64: 32, 32>}, {pipeline_mode = #tpu.pipeline_mode<synchronous>, transform_indices = @transform_8, window_bounds = array<i64: 1, 32>}, {pipeline_mode = #tpu.pipeline_mode<synchronous>, transform_indices = @transform_9, window_bounds = array<i64: 32, 64>}, {pipeline_mode = #tpu.pipeline_mode<synchronous>, transform_indices = @transform_10, window_bounds = array<i64: 1, 64>}, {transform_indices = @transform_11, window_bounds = array<i64: 16, 64>}]} {
    %c0 = arith.constant 0 : index
    %c0_0 = arith.constant 0 : index
    %0 = vector.load %arg1[%c0, %c0_0] : memref<16x32xbf16, #tpu.memory_space<vmem>>, vector<16x32xbf16>
    %c0_1 = arith.constant 0 : index
    %c0_2 = arith.constant 0 : index
    %1 = vector.load %arg4[%c0_1, %c0_2] : memref<32x32xbf16, #tpu.memory_space<vmem>>, vector<32x32xbf16>
    %cst = arith.constant dense<0.000000e+00> : vector<16x32xf32>
    %2 = tpu.matmul %0, %1, %cst {dimension_numbers = #tpu.dot_dimension_numbers<[1], [0], [0], [1], [0, 0, 1, 1], [], []>} : vector<16x32xbf16>, vector<32x32xbf16>, vector<16x32xf32> -> vector<16x32xf32>
    %c0_3 = arith.constant 0 : index
    %c0_4 = arith.constant 0 : index
    %3 = vector.load %arg5[%c0_3, %c0_4] : memref<1x32xf32, #tpu.memory_space<vmem>>, vector<1x32xf32>
    %4 = vector.broadcast %3 : vector<1x32xf32> to vector<16x32xf32>
    %5 = arith.addf %2, %4 : vector<16x32xf32>
    %c0_5 = arith.constant 0 : index
    %c0_6 = arith.constant 0 : index
    %6 = vector.load %arg2[%c0_5, %c0_6] : memref<16x32xbf16, #tpu.memory_space<vmem>>, vector<16x32xbf16>
    %c0_7 = arith.constant 0 : index
    %c0_8 = arith.constant 0 : index
    %7 = vector.load %arg6[%c0_7, %c0_8] : memref<32x32xbf16, #tpu.memory_space<vmem>>, vector<32x32xbf16>
    %cst_9 = arith.constant dense<0.000000e+00> : vector<16x32xf32>
    %8 = tpu.matmul %6, %7, %cst_9 {dimension_numbers = #tpu.dot_dimension_numbers<[1], [0], [0], [1], [0, 0, 1, 1], [], []>} : vector<16x32xbf16>, vector<32x32xbf16>, vector<16x32xf32> -> vector<16x32xf32>
    %c0_10 = arith.constant 0 : index
    %c0_11 = arith.constant 0 : index
    %9 = vector.load %arg7[%c0_10, %c0_11] : memref<1x32xf32, #tpu.memory_space<vmem>>, vector<1x32xf32>
    %10 = vector.broadcast %9 : vector<1x32xf32> to vector<16x32xf32>
    %11 = arith.addf %8, %10 : vector<16x32xf32>
    %c0_12 = arith.constant 0 : index
    %c0_13 = arith.constant 0 : index
    %12 = vector.load %arg3[%c0_12, %c0_13] : memref<16x32xbf16, #tpu.memory_space<vmem>>, vector<16x32xbf16>
    %c0_14 = arith.constant 0 : index
    %c0_15 = arith.constant 0 : index
    %13 = vector.load %arg8[%c0_14, %c0_15] : memref<32x32xbf16, #tpu.memory_space<vmem>>, vector<32x32xbf16>
    %cst_16 = arith.constant dense<0.000000e+00> : vector<16x32xf32>
    %14 = tpu.matmul %12, %13, %cst_16 {dimension_numbers = #tpu.dot_dimension_numbers<[1], [0], [0], [1], [0, 0, 1, 1], [], []>} : vector<16x32xbf16>, vector<32x32xbf16>, vector<16x32xf32> -> vector<16x32xf32>
    %c0_17 = arith.constant 0 : index
    %c0_18 = arith.constant 0 : index
    %15 = vector.load %arg9[%c0_17, %c0_18] : memref<1x32xf32, #tpu.memory_space<vmem>>, vector<1x32xf32>
    %16 = vector.broadcast %15 : vector<1x32xf32> to vector<16x32xf32>
    %17 = arith.addf %14, %16 : vector<16x32xf32>
    %18 = vector.extract_strided_slice %5 {offsets = [0, 0], sizes = [8, 32], strides = [1, 1]} : vector<16x32xf32> to vector<8x32xf32>
    %19 = vector.extract_strided_slice %11 {offsets = [0, 0], sizes = [8, 32], strides = [1, 1]} : vector<16x32xf32> to vector<8x32xf32>
    %20 = vector.extract_strided_slice %17 {offsets = [0, 0], sizes = [8, 32], strides = [1, 1]} : vector<16x32xf32> to vector<8x32xf32>
    %21 = vector.extract_strided_slice %18 {offsets = [0, 0], sizes = [8, 8], strides = [1, 1]} : vector<8x32xf32> to vector<8x8xf32>
    %22 = arith.truncf %21 : vector<8x8xf32> to vector<8x8xbf16>
    %23 = vector.extract_strided_slice %19 {offsets = [0, 0], sizes = [8, 8], strides = [1, 1]} : vector<8x32xf32> to vector<8x8xf32>
    %24 = arith.truncf %23 : vector<8x8xf32> to vector<8x8xbf16>
    %25 = vector.extract_strided_slice %20 {offsets = [0, 0], sizes = [8, 8], strides = [1, 1]} : vector<8x32xf32> to vector<8x8xf32>
    %26 = arith.truncf %25 : vector<8x8xf32> to vector<8x8xbf16>
    %cst_19 = arith.constant dense<0.000000e+00> : vector<8x8xf32>
    %27 = tpu.matmul %22, %24, %cst_19 {dimension_numbers = #tpu.dot_dimension_numbers<[1], [1], [0], [0], [0, 0, 1, 0], [], []>} : vector<8x8xbf16>, vector<8x8xbf16>, vector<8x8xf32> -> vector<8x8xf32>
    %cst_20 = arith.constant dense<0xFF800000> : vector<8xf32>
    %28 = vector.multi_reduction <maximumf>, %27, %cst_20 [1] : vector<8x8xf32> to vector<8xf32>
    %29 = vector.shape_cast %28 : vector<8xf32> to vector<8x1xf32>
    %30 = vector.broadcast %29 : vector<8x1xf32> to vector<8x8xf32>
    %31 = arith.subf %27, %30 : vector<8x8xf32>
    %32 = math.exp %31 : vector<8x8xf32>
    %cst_21 = arith.constant dense<0.000000e+00> : vector<8xf32>
    %33 = vector.multi_reduction <add>, %32, %cst_21 [1] : vector<8x8xf32> to vector<8xf32>
    %34 = vector.shape_cast %33 : vector<8xf32> to vector<8x1xf32>
    %35 = vector.broadcast %34 : vector<8x1xf32> to vector<8x8xf32>
    %36 = arith.divf %32, %35 : vector<8x8xf32>
    %37 = arith.truncf %36 : vector<8x8xf32> to vector<8x8xbf16>
    %cst_22 = arith.constant dense<0.000000e+00> : vector<8x8xf32>
    %38 = tpu.matmul %37, %26, %cst_22 {dimension_numbers = #tpu.dot_dimension_numbers<[1], [0], [0], [1], [0, 0, 1, 1], [], []>} : vector<8x8xbf16>, vector<8x8xbf16>, vector<8x8xf32> -> vector<8x8xf32>
    %39 = vector.extract_strided_slice %18 {offsets = [0, 8], sizes = [8, 8], strides = [1, 1]} : vector<8x32xf32> to vector<8x8xf32>
    %40 = arith.truncf %39 : vector<8x8xf32> to vector<8x8xbf16>
    %41 = vector.extract_strided_slice %19 {offsets = [0, 8], sizes = [8, 8], strides = [1, 1]} : vector<8x32xf32> to vector<8x8xf32>
    %42 = arith.truncf %41 : vector<8x8xf32> to vector<8x8xbf16>
    %43 = vector.extract_strided_slice %20 {offsets = [0, 8], sizes = [8, 8], strides = [1, 1]} : vector<8x32xf32> to vector<8x8xf32>
    %44 = arith.truncf %43 : vector<8x8xf32> to vector<8x8xbf16>
    %cst_23 = arith.constant dense<0.000000e+00> : vector<8x8xf32>
    %45 = tpu.matmul %40, %42, %cst_23 {dimension_numbers = #tpu.dot_dimension_numbers<[1], [1], [0], [0], [0, 0, 1, 0], [], []>} : vector<8x8xbf16>, vector<8x8xbf16>, vector<8x8xf32> -> vector<8x8xf32>
    %cst_24 = arith.constant dense<0xFF800000> : vector<8xf32>
    %46 = vector.multi_reduction <maximumf>, %45, %cst_24 [1] : vector<8x8xf32> to vector<8xf32>
    %47 = vector.shape_cast %46 : vector<8xf32> to vector<8x1xf32>
    %48 = vector.broadcast %47 : vector<8x1xf32> to vector<8x8xf32>
    %49 = arith.subf %45, %48 : vector<8x8xf32>
    %50 = math.exp %49 : vector<8x8xf32>
    %cst_25 = arith.constant dense<0.000000e+00> : vector<8xf32>
    %51 = vector.multi_reduction <add>, %50, %cst_25 [1] : vector<8x8xf32> to vector<8xf32>
    %52 = vector.shape_cast %51 : vector<8xf32> to vector<8x1xf32>
    %53 = vector.broadcast %52 : vector<8x1xf32> to vector<8x8xf32>
    %54 = arith.divf %50, %53 : vector<8x8xf32>
    %55 = arith.truncf %54 : vector<8x8xf32> to vector<8x8xbf16>
    %cst_26 = arith.constant dense<0.000000e+00> : vector<8x8xf32>
    %56 = tpu.matmul %55, %44, %cst_26 {dimension_numbers = #tpu.dot_dimension_numbers<[1], [0], [0], [1], [0, 0, 1, 1], [], []>} : vector<8x8xbf16>, vector<8x8xbf16>, vector<8x8xf32> -> vector<8x8xf32>
    %57 = vector.extract_strided_slice %18 {offsets = [0, 16], sizes = [8, 8], strides = [1, 1]} : vector<8x32xf32> to vector<8x8xf32>
    %58 = arith.truncf %57 : vector<8x8xf32> to vector<8x8xbf16>
    %59 = vector.extract_strided_slice %19 {offsets = [0, 16], sizes = [8, 8], strides = [1, 1]} : vector<8x32xf32> to vector<8x8xf32>
    %60 = arith.truncf %59 : vector<8x8xf32> to vector<8x8xbf16>
    %61 = vector.extract_strided_slice %20 {offsets = [0, 16], sizes = [8, 8], strides = [1, 1]} : vector<8x32xf32> to vector<8x8xf32>
    %62 = arith.truncf %61 : vector<8x8xf32> to vector<8x8xbf16>
    %cst_27 = arith.constant dense<0.000000e+00> : vector<8x8xf32>
    %63 = tpu.matmul %58, %60, %cst_27 {dimension_numbers = #tpu.dot_dimension_numbers<[1], [1], [0], [0], [0, 0, 1, 0], [], []>} : vector<8x8xbf16>, vector<8x8xbf16>, vector<8x8xf32> -> vector<8x8xf32>
    %cst_28 = arith.constant dense<0xFF800000> : vector<8xf32>
    %64 = vector.multi_reduction <maximumf>, %63, %cst_28 [1] : vector<8x8xf32> to vector<8xf32>
    %65 = vector.shape_cast %64 : vector<8xf32> to vector<8x1xf32>
    %66 = vector.broadcast %65 : vector<8x1xf32> to vector<8x8xf32>
    %67 = arith.subf %63, %66 : vector<8x8xf32>
    %68 = math.exp %67 : vector<8x8xf32>
    %cst_29 = arith.constant dense<0.000000e+00> : vector<8xf32>
    %69 = vector.multi_reduction <add>, %68, %cst_29 [1] : vector<8x8xf32> to vector<8xf32>
    %70 = vector.shape_cast %69 : vector<8xf32> to vector<8x1xf32>
    %71 = vector.broadcast %70 : vector<8x1xf32> to vector<8x8xf32>
    %72 = arith.divf %68, %71 : vector<8x8xf32>
    %73 = arith.truncf %72 : vector<8x8xf32> to vector<8x8xbf16>
    %cst_30 = arith.constant dense<0.000000e+00> : vector<8x8xf32>
    %74 = tpu.matmul %73, %62, %cst_30 {dimension_numbers = #tpu.dot_dimension_numbers<[1], [0], [0], [1], [0, 0, 1, 1], [], []>} : vector<8x8xbf16>, vector<8x8xbf16>, vector<8x8xf32> -> vector<8x8xf32>
    %75 = vector.extract_strided_slice %18 {offsets = [0, 24], sizes = [8, 8], strides = [1, 1]} : vector<8x32xf32> to vector<8x8xf32>
    %76 = arith.truncf %75 : vector<8x8xf32> to vector<8x8xbf16>
    %77 = vector.extract_strided_slice %19 {offsets = [0, 24], sizes = [8, 8], strides = [1, 1]} : vector<8x32xf32> to vector<8x8xf32>
    %78 = arith.truncf %77 : vector<8x8xf32> to vector<8x8xbf16>
    %79 = vector.extract_strided_slice %20 {offsets = [0, 24], sizes = [8, 8], strides = [1, 1]} : vector<8x32xf32> to vector<8x8xf32>
    %80 = arith.truncf %79 : vector<8x8xf32> to vector<8x8xbf16>
    %cst_31 = arith.constant dense<0.000000e+00> : vector<8x8xf32>
    %81 = tpu.matmul %76, %78, %cst_31 {dimension_numbers = #tpu.dot_dimension_numbers<[1], [1], [0], [0], [0, 0, 1, 0], [], []>} : vector<8x8xbf16>, vector<8x8xbf16>, vector<8x8xf32> -> vector<8x8xf32>
    %cst_32 = arith.constant dense<0xFF800000> : vector<8xf32>
    %82 = vector.multi_reduction <maximumf>, %81, %cst_32 [1] : vector<8x8xf32> to vector<8xf32>
    %83 = vector.shape_cast %82 : vector<8xf32> to vector<8x1xf32>
    %84 = vector.broadcast %83 : vector<8x1xf32> to vector<8x8xf32>
    %85 = arith.subf %81, %84 : vector<8x8xf32>
    %86 = math.exp %85 : vector<8x8xf32>
    %cst_33 = arith.constant dense<0.000000e+00> : vector<8xf32>
    %87 = vector.multi_reduction <add>, %86, %cst_33 [1] : vector<8x8xf32> to vector<8xf32>
    %88 = vector.shape_cast %87 : vector<8xf32> to vector<8x1xf32>
    %89 = vector.broadcast %88 : vector<8x1xf32> to vector<8x8xf32>
    %90 = arith.divf %86, %89 : vector<8x8xf32>
    %91 = arith.truncf %90 : vector<8x8xf32> to vector<8x8xbf16>
    %cst_34 = arith.constant dense<0.000000e+00> : vector<8x8xf32>
    %92 = tpu.matmul %91, %80, %cst_34 {dimension_numbers = #tpu.dot_dimension_numbers<[1], [0], [0], [1], [0, 0, 1, 1], [], []>} : vector<8x8xbf16>, vector<8x8xbf16>, vector<8x8xf32> -> vector<8x8xf32>
    %93 = tpu.concatenate %38, %56, %74, %92 in 1 : vector<8x8xf32>, vector<8x8xf32>, vector<8x8xf32>, vector<8x8xf32> -> vector<8x32xf32>
    %94 = vector.extract_strided_slice %5 {offsets = [8, 0], sizes = [8, 32], strides = [1, 1]} : vector<16x32xf32> to vector<8x32xf32>
    %95 = vector.extract_strided_slice %11 {offsets = [8, 0], sizes = [8, 32], strides = [1, 1]} : vector<16x32xf32> to vector<8x32xf32>
    %96 = vector.extract_strided_slice %17 {offsets = [8, 0], sizes = [8, 32], strides = [1, 1]} : vector<16x32xf32> to vector<8x32xf32>
    %97 = vector.extract_strided_slice %94 {offsets = [0, 0], sizes = [8, 8], strides = [1, 1]} : vector<8x32xf32> to vector<8x8xf32>
    %98 = arith.truncf %97 : vector<8x8xf32> to vector<8x8xbf16>
    %99 = vector.extract_strided_slice %95 {offsets = [0, 0], sizes = [8, 8], strides = [1, 1]} : vector<8x32xf32> to vector<8x8xf32>
    %100 = arith.truncf %99 : vector<8x8xf32> to vector<8x8xbf16>
    %101 = vector.extract_strided_slice %96 {offsets = [0, 0], sizes = [8, 8], strides = [1, 1]} : vector<8x32xf32> to vector<8x8xf32>
    %102 = arith.truncf %101 : vector<8x8xf32> to vector<8x8xbf16>
    %cst_35 = arith.constant dense<0.000000e+00> : vector<8x8xf32>
    %103 = tpu.matmul %98, %100, %cst_35 {dimension_numbers = #tpu.dot_dimension_numbers<[1], [1], [0], [0], [0, 0, 1, 0], [], []>} : vector<8x8xbf16>, vector<8x8xbf16>, vector<8x8xf32> -> vector<8x8xf32>
    %cst_36 = arith.constant dense<0xFF800000> : vector<8xf32>
    %104 = vector.multi_reduction <maximumf>, %103, %cst_36 [1] : vector<8x8xf32> to vector<8xf32>
    %105 = vector.shape_cast %104 : vector<8xf32> to vector<8x1xf32>
    %106 = vector.broadcast %105 : vector<8x1xf32> to vector<8x8xf32>
    %107 = arith.subf %103, %106 : vector<8x8xf32>
    %108 = math.exp %107 : vector<8x8xf32>
    %cst_37 = arith.constant dense<0.000000e+00> : vector<8xf32>
    %109 = vector.multi_reduction <add>, %108, %cst_37 [1] : vector<8x8xf32> to vector<8xf32>
    %110 = vector.shape_cast %109 : vector<8xf32> to vector<8x1xf32>
    %111 = vector.broadcast %110 : vector<8x1xf32> to vector<8x8xf32>
    %112 = arith.divf %108, %111 : vector<8x8xf32>
    %113 = arith.truncf %112 : vector<8x8xf32> to vector<8x8xbf16>
    %cst_38 = arith.constant dense<0.000000e+00> : vector<8x8xf32>
    %114 = tpu.matmul %113, %102, %cst_38 {dimension_numbers = #tpu.dot_dimension_numbers<[1], [0], [0], [1], [0, 0, 1, 1], [], []>} : vector<8x8xbf16>, vector<8x8xbf16>, vector<8x8xf32> -> vector<8x8xf32>
    %115 = vector.extract_strided_slice %94 {offsets = [0, 8], sizes = [8, 8], strides = [1, 1]} : vector<8x32xf32> to vector<8x8xf32>
    %116 = arith.truncf %115 : vector<8x8xf32> to vector<8x8xbf16>
    %117 = vector.extract_strided_slice %95 {offsets = [0, 8], sizes = [8, 8], strides = [1, 1]} : vector<8x32xf32> to vector<8x8xf32>
    %118 = arith.truncf %117 : vector<8x8xf32> to vector<8x8xbf16>
    %119 = vector.extract_strided_slice %96 {offsets = [0, 8], sizes = [8, 8], strides = [1, 1]} : vector<8x32xf32> to vector<8x8xf32>
    %120 = arith.truncf %119 : vector<8x8xf32> to vector<8x8xbf16>
    %cst_39 = arith.constant dense<0.000000e+00> : vector<8x8xf32>
    %121 = tpu.matmul %116, %118, %cst_39 {dimension_numbers = #tpu.dot_dimension_numbers<[1], [1], [0], [0], [0, 0, 1, 0], [], []>} : vector<8x8xbf16>, vector<8x8xbf16>, vector<8x8xf32> -> vector<8x8xf32>
    %cst_40 = arith.constant dense<0xFF800000> : vector<8xf32>
    %122 = vector.multi_reduction <maximumf>, %121, %cst_40 [1] : vector<8x8xf32> to vector<8xf32>
    %123 = vector.shape_cast %122 : vector<8xf32> to vector<8x1xf32>
    %124 = vector.broadcast %123 : vector<8x1xf32> to vector<8x8xf32>
    %125 = arith.subf %121, %124 : vector<8x8xf32>
    %126 = math.exp %125 : vector<8x8xf32>
    %cst_41 = arith.constant dense<0.000000e+00> : vector<8xf32>
    %127 = vector.multi_reduction <add>, %126, %cst_41 [1] : vector<8x8xf32> to vector<8xf32>
    %128 = vector.shape_cast %127 : vector<8xf32> to vector<8x1xf32>
    %129 = vector.broadcast %128 : vector<8x1xf32> to vector<8x8xf32>
    %130 = arith.divf %126, %129 : vector<8x8xf32>
    %131 = arith.truncf %130 : vector<8x8xf32> to vector<8x8xbf16>
    %cst_42 = arith.constant dense<0.000000e+00> : vector<8x8xf32>
    %132 = tpu.matmul %131, %120, %cst_42 {dimension_numbers = #tpu.dot_dimension_numbers<[1], [0], [0], [1], [0, 0, 1, 1], [], []>} : vector<8x8xbf16>, vector<8x8xbf16>, vector<8x8xf32> -> vector<8x8xf32>
    %133 = vector.extract_strided_slice %94 {offsets = [0, 16], sizes = [8, 8], strides = [1, 1]} : vector<8x32xf32> to vector<8x8xf32>
    %134 = arith.truncf %133 : vector<8x8xf32> to vector<8x8xbf16>
    %135 = vector.extract_strided_slice %95 {offsets = [0, 16], sizes = [8, 8], strides = [1, 1]} : vector<8x32xf32> to vector<8x8xf32>
    %136 = arith.truncf %135 : vector<8x8xf32> to vector<8x8xbf16>
    %137 = vector.extract_strided_slice %96 {offsets = [0, 16], sizes = [8, 8], strides = [1, 1]} : vector<8x32xf32> to vector<8x8xf32>
    %138 = arith.truncf %137 : vector<8x8xf32> to vector<8x8xbf16>
    %cst_43 = arith.constant dense<0.000000e+00> : vector<8x8xf32>
    %139 = tpu.matmul %134, %136, %cst_43 {dimension_numbers = #tpu.dot_dimension_numbers<[1], [1], [0], [0], [0, 0, 1, 0], [], []>} : vector<8x8xbf16>, vector<8x8xbf16>, vector<8x8xf32> -> vector<8x8xf32>
    %cst_44 = arith.constant dense<0xFF800000> : vector<8xf32>
    %140 = vector.multi_reduction <maximumf>, %139, %cst_44 [1] : vector<8x8xf32> to vector<8xf32>
    %141 = vector.shape_cast %140 : vector<8xf32> to vector<8x1xf32>
    %142 = vector.broadcast %141 : vector<8x1xf32> to vector<8x8xf32>
    %143 = arith.subf %139, %142 : vector<8x8xf32>
    %144 = math.exp %143 : vector<8x8xf32>
    %cst_45 = arith.constant dense<0.000000e+00> : vector<8xf32>
    %145 = vector.multi_reduction <add>, %144, %cst_45 [1] : vector<8x8xf32> to vector<8xf32>
    %146 = vector.shape_cast %145 : vector<8xf32> to vector<8x1xf32>
    %147 = vector.broadcast %146 : vector<8x1xf32> to vector<8x8xf32>
    %148 = arith.divf %144, %147 : vector<8x8xf32>
    %149 = arith.truncf %148 : vector<8x8xf32> to vector<8x8xbf16>
    %cst_46 = arith.constant dense<0.000000e+00> : vector<8x8xf32>
    %150 = tpu.matmul %149, %138, %cst_46 {dimension_numbers = #tpu.dot_dimension_numbers<[1], [0], [0], [1], [0, 0, 1, 1], [], []>} : vector<8x8xbf16>, vector<8x8xbf16>, vector<8x8xf32> -> vector<8x8xf32>
    %151 = vector.extract_strided_slice %94 {offsets = [0, 24], sizes = [8, 8], strides = [1, 1]} : vector<8x32xf32> to vector<8x8xf32>
    %152 = arith.truncf %151 : vector<8x8xf32> to vector<8x8xbf16>
    %153 = vector.extract_strided_slice %95 {offsets = [0, 24], sizes = [8, 8], strides = [1, 1]} : vector<8x32xf32> to vector<8x8xf32>
    %154 = arith.truncf %153 : vector<8x8xf32> to vector<8x8xbf16>
    %155 = vector.extract_strided_slice %96 {offsets = [0, 24], sizes = [8, 8], strides = [1, 1]} : vector<8x32xf32> to vector<8x8xf32>
    %156 = arith.truncf %155 : vector<8x8xf32> to vector<8x8xbf16>
    %cst_47 = arith.constant dense<0.000000e+00> : vector<8x8xf32>
    %157 = tpu.matmul %152, %154, %cst_47 {dimension_numbers = #tpu.dot_dimension_numbers<[1], [1], [0], [0], [0, 0, 1, 0], [], []>} : vector<8x8xbf16>, vector<8x8xbf16>, vector<8x8xf32> -> vector<8x8xf32>
    %cst_48 = arith.constant dense<0xFF800000> : vector<8xf32>
    %158 = vector.multi_reduction <maximumf>, %157, %cst_48 [1] : vector<8x8xf32> to vector<8xf32>
    %159 = vector.shape_cast %158 : vector<8xf32> to vector<8x1xf32>
    %160 = vector.broadcast %159 : vector<8x1xf32> to vector<8x8xf32>
    %161 = arith.subf %157, %160 : vector<8x8xf32>
    %162 = math.exp %161 : vector<8x8xf32>
    %cst_49 = arith.constant dense<0.000000e+00> : vector<8xf32>
    %163 = vector.multi_reduction <add>, %162, %cst_49 [1] : vector<8x8xf32> to vector<8xf32>
    %164 = vector.shape_cast %163 : vector<8xf32> to vector<8x1xf32>
    %165 = vector.broadcast %164 : vector<8x1xf32> to vector<8x8xf32>
    %166 = arith.divf %162, %165 : vector<8x8xf32>
    %167 = arith.truncf %166 : vector<8x8xf32> to vector<8x8xbf16>
    %cst_50 = arith.constant dense<0.000000e+00> : vector<8x8xf32>
    %168 = tpu.matmul %167, %156, %cst_50 {dimension_numbers = #tpu.dot_dimension_numbers<[1], [0], [0], [1], [0, 0, 1, 1], [], []>} : vector<8x8xbf16>, vector<8x8xbf16>, vector<8x8xf32> -> vector<8x8xf32>
    %169 = tpu.concatenate %114, %132, %150, %168 in 1 : vector<8x8xf32>, vector<8x8xf32>, vector<8x8xf32>, vector<8x8xf32> -> vector<8x32xf32>
    %170 = tpu.concatenate %93, %169 in 0 : vector<8x32xf32>, vector<8x32xf32> -> vector<16x32xf32>
    %171 = arith.truncf %170 : vector<16x32xf32> to vector<16x32xbf16>
    %c0_51 = arith.constant 0 : index
    %c0_52 = arith.constant 0 : index
    %172 = vector.load %arg10[%c0_51, %c0_52] : memref<32x64xbf16, #tpu.memory_space<vmem>>, vector<32x64xbf16>
    %cst_53 = arith.constant dense<0.000000e+00> : vector<16x64xf32>
    %173 = tpu.matmul %171, %172, %cst_53 {dimension_numbers = #tpu.dot_dimension_numbers<[1], [0], [0], [1], [0, 0, 1, 1], [], []>} : vector<16x32xbf16>, vector<32x64xbf16>, vector<16x64xf32> -> vector<16x64xf32>
    %c0_54 = arith.constant 0 : index
    %c0_55 = arith.constant 0 : index
    %174 = vector.load %arg11[%c0_54, %c0_55] : memref<1x64xf32, #tpu.memory_space<vmem>>, vector<1x64xf32>
    %175 = vector.broadcast %174 : vector<1x64xf32> to vector<16x64xf32>
    %176 = arith.addf %173, %175 : vector<16x64xf32>
    %c0_56 = arith.constant 0 : index
    %c0_57 = arith.constant 0 : index
    %177 = vector.load %arg12[%c0_56, %c0_57] : memref<16x64xf32, #tpu.memory_space<vmem>>, vector<16x64xf32>
    tpu.vector_store %arg12[%c0_56, %c0_57], %176 {strides = array<i32>} : memref<16x64xf32, #tpu.memory_space<vmem>>, vector<16x64xf32>,
    return
  }
  func.func @transform_0(%arg0: i32) -> (i32, i32) {
    %c0_i32 = arith.constant 0 : i32
    %c0_i32_0 = arith.constant 0 : i32
    return %arg0, %c0_i32 : i32, i32
  }
  func.func @transform_1(%arg0: i32) -> (i32, i32) {
    %c0_i32 = arith.constant 0 : i32
    %c0_i32_0 = arith.constant 0 : i32
    return %arg0, %c0_i32 : i32, i32
  }
  func.func @transform_2(%arg0: i32) -> (i32, i32) {
    %c0_i32 = arith.constant 0 : i32
    %c0_i32_0 = arith.constant 0 : i32
    return %arg0, %c0_i32 : i32, i32
  }
  func.func @transform_3(%arg0: i32) -> (i32, i32) {
    %c0_i32 = arith.constant 0 : i32
    %c0_i32_0 = arith.constant 0 : i32
    %c0_i32_1 = arith.constant 0 : i32
    return %c0_i32, %c0_i32_0 : i32, i32
  }
  func.func @transform_4(%arg0: i32) -> (i32, i32) {
    %c0_i32 = arith.constant 0 : i32
    %c0_i32_0 = arith.constant 0 : i32
    %c0_i32_1 = arith.constant 0 : i32
    return %c0_i32, %c0_i32_0 : i32, i32
  }
  func.func @transform_5(%arg0: i32) -> (i32, i32) {
    %c0_i32 = arith.constant 0 : i32
    %c0_i32_0 = arith.constant 0 : i32
    %c0_i32_1 = arith.constant 0 : i32
    return %c0_i32, %c0_i32_0 : i32, i32
  }
  func.func @transform_6(%arg0: i32) -> (i32, i32) {
    %c0_i32 = arith.constant 0 : i32
    %c0_i32_0 = arith.constant 0 : i32
    %c0_i32_1 = arith.constant 0 : i32
    return %c0_i32, %c0_i32_0 : i32, i32
  }
  func.func @transform_7(%arg0: i32) -> (i32, i32) {
    %c0_i32 = arith.constant 0 : i32
    %c0_i32_0 = arith.constant 0 : i32
    %c0_i32_1 = arith.constant 0 : i32
    return %c0_i32, %c0_i32_0 : i32, i32
  }
  func.func @transform_8(%arg0: i32) -> (i32, i32) {
    %c0_i32 = arith.constant 0 : i32
    %c0_i32_0 = arith.constant 0 : i32
    %c0_i32_1 = arith.constant 0 : i32
    return %c0_i32, %c0_i32_0 : i32, i32
  }
  func.func @transform_9(%arg0: i32) -> (i32, i32) {
    %c0_i32 = arith.constant 0 : i32
    %c0_i32_0 = arith.constant 0 : i32
    %c0_i32_1 = arith.constant 0 : i32
    return %c0_i32, %c0_i32_0 : i32, i32
  }
  func.func @transform_10(%arg0: i32) -> (i32, i32) {
    %c0_i32 = arith.constant 0 : i32
    %c0_i32_0 = arith.constant 0 : i32
    %c0_i32_1 = arith.constant 0 : i32
    return %c0_i32, %c0_i32_0 : i32, i32
  }
  func.func @transform_11(%arg0: i32) -> (i32, i32) {
    %c0_i32 = arith.constant 0 : i32
    %c0_i32_0 = arith.constant 0 : i32
    return %arg0, %c0_i32 : i32, i32
  }
}

</mosaic_0001>

<bundles_post_ra>
// kernel: tpu_custom_call.1
= control target key start
LH: loop header
LB: loop body
LE: loop exit
PB: predicated region body
PF: predicated region fallthrough
CT: control target
= control target key end

     0   :  { %16 = vsyncpa [#allocation3], 0  ;;  %s2189_s0 = inlined_call_operand.hbm [shape: bf16[16,32], index: 0, kind: input, shape index: {}]   ;;  %s2190_s1 = inlined_call_operand.hbm [shape: bf16[16,32], index: 1, kind: input, shape index: {}]   ;;  %s2191_s2 = inlined_call_operand.hbm [shape: bf16[16,32], index: 2, kind: input, shape index: {}]   ;;  %s2192_s3 = inlined_call_operand.hbm [shape: bf16[32,32], index: 3, kind: input, shape index: {}]   ;;  %s2193_s4 = inlined_call_operand.vmem [shape: f32[1,32], index: 4, kind: input, shape index: {}]   ;;  %s2194_s5 = inlined_call_operand.vmem [shape: bf16[32,32], index: 5, kind: input, shape index: {}]   ;;  %s2195_s6 = inlined_call_operand.vmem [shape: f32[1,32], index: 6, kind: input, shape index: {}]   ;;  %s2196_s7 = inlined_call_operand.hbm [shape: bf16[32,32], index: 7, kind: input, shape index: {}]   ;;  %s2197_s8 = inlined_call_operand.hbm [shape: f32[1,32], index: 8, kind: input, shape index: {}]   ;;  %s2198_s9 = inlined_call_operand.vmem [shape: bf16[32,64], index: 9, kind: input, shape index: {}]   ;;  %s2199_s10 = inlined_call_operand.vmem [shape: f32[1,64], index: 10, kind: input, shape index: {}]   ;;  %s2200_s11 = inlined_call_operand.hbm [shape: f32[16,64], index: 11, kind: output, shape index: {}]  }
   0x1   :  { %17 = vsyncpa [#allocation6], 0 }
   0x2   :  { %18 = vsyncpa [#allocation9], 0 }
   0x3   :  { %19 = vsyncpa [#allocation12], 0 }
   0x4   :  { %20 = vsyncpa [#allocation4], 0  ;;  %s1795_s17 = smov [#allocation5]   ;;  %s1796_s19 = smov [#allocation8]  }
   0x5   :  { %s38_s18 = sshll.u32 %s1795_s17, 4  ;;  %s62_s20 = sshll.u32 %s1796_s19, 4  ;;  %s39_s18 = int_to_ptr.vmem [resolvable:$true] %s38_s18  ;;  %s1873_s20 = int_to_ptr.vmem [resolvable:$true] %s62_s20 }
   0x6   :  { %s1631_s23 = scalar_lea.hbm %s2190_s1, 128 }
   0x7   :  { %p1632_p0 = scmp.ne.s32.totalorder %s2190_s1, %s1631_s23  ;;  %p1635_p1 = scmp.lt.u32.totalorder %s1631_s23, %s2190_s1 }
   0x9   :  { %p1637_p2 = pnand %p1635_p1, %p1632_p0 }
   0xb   :  { %1640 = shalt.err (!%p1637_p2)
}
   0xc   :  { %s1641_s28 = scalar_lea.vmem %s39_s18, 128  ;;  %p1646_p4 = scmp.lt.s32.totalorder %s39_s18, %s39_s18 }
   0xd   :  { %p1642_p3 = scmp.ne.s32.totalorder %s39_s18, %s1641_s28  ;;  %p1647_p5 = scmp.lt.s32.totalorder %s1641_s28, %s1641_s28 }
   0xf   :  { %p1648_p6 = por %p1647_p5, %p1646_p4 }
  0x11   :  { %p1649_p7 = pnand %p1648_p6, %p1642_p3 }
  0x13   :  { %1652 = shalt.err (!%p1649_p7)
}
  0x14   :  { %s1797_s29 = smov 64   ;;  %s1798_s30 = smov 4  }
  0x15   :  { %44 = dma.hbm_to_vmem [thread:$0]  %s2190_s1, 128, %s39_s18, [#allocation6], %s1797_s29, %s1797_s29, %s1798_s30  }
  0x16   :  { %s1653_s16 = scalar_lea.hbm %s2192_s3, 256 }
  0x17   :  { %p1654_p8 = scmp.ne.s32.totalorder %s2192_s3, %s1653_s16  ;;  %p1657_p9 = scmp.lt.u32.totalorder %s1653_s16, %s2192_s3 }
  0x19   :  { %p1659_p10 = pnand %p1657_p9, %p1654_p8 }
  0x1b   :  { %1662 = shalt.err (!%p1659_p10)
}
  0x1c   :  { %s1663_s23 = scalar_lea.vmem %s1873_s20, 256  ;;  %p1668_p12 = scmp.lt.s32.totalorder %s1873_s20, %s1873_s20 }
  0x1d   :  { %p1664_p11 = scmp.ne.s32.totalorder %s1873_s20, %s1663_s23  ;;  %p1669_p13 = scmp.lt.s32.totalorder %s1663_s23, %s1663_s23 }
  0x1f   :  { %p1670_p0 = por %p1669_p13, %p1668_p12 }
  0x21   :  { %p1671_p1 = pnand %p1670_p0, %p1664_p11 }
  0x23   :  { %1674 = shalt.err (!%p1671_p1)
}
  0x24   :  { %68 = dma.hbm_to_vmem [thread:$0]  %s2192_s3, 256, %s1873_s20, [#allocation9], %s1797_s29, %s1797_s29, %s1798_s30  }
  0x25   :  { %s1799_s24 = smov [#allocation2]   ;;  %s1800_s26 = smov [#allocation7]  }
  0x26   :  { %s26_s25 = sshll.u32 %s1799_s24, 4  ;;  %s50_s27 = sshll.u32 %s1800_s26, 4  ;;  %s27_s25 = int_to_ptr.vmem [resolvable:$true] %s26_s25  ;;  %s1910_s27 = int_to_ptr.vmem [resolvable:$true] %s50_s27 }
  0x27   :  { %s1675_s13 = scalar_lea.hbm %s2189_s0, 128 }
  0x28   :  { %p1676_p2 = scmp.ne.s32.totalorder %s2189_s0, %s1675_s13  ;;  %p1679_p3 = scmp.lt.u32.totalorder %s1675_s13, %s2189_s0 }
  0x2a   :  { %p1681_p4 = pnand %p1679_p3, %p1676_p2 }
  0x2c   :  { %1684 = shalt.err (!%p1681_p4)
}
  0x2d   :  { %s1685_s3 = scalar_lea.vmem %s27_s25, 128  ;;  %p1690_p6 = scmp.lt.s32.totalorder %s27_s25, %s27_s25 }
  0x2e   :  { %p1686_p5 = scmp.ne.s32.totalorder %s27_s25, %s1685_s3  ;;  %p1691_p7 = scmp.lt.s32.totalorder %s1685_s3, %s1685_s3 }
  0x30   :  { %p1692_p8 = por %p1691_p7, %p1690_p6 }
  0x32   :  { %p1693_p9 = pnand %p1692_p8, %p1686_p5 }
  0x34   :  { %1696 = shalt.err (!%p1693_p9)
}
  0x35   :  { %32 = dma.hbm_to_vmem [thread:$0]  %s2189_s0, 128, %s27_s25, [#allocation3], %s1797_s29, %s1797_s29, %s1798_s30  }
  0x36   :  { %s1697_s23 = scalar_lea.hbm %s2191_s2, 128 }
  0x37   :  { %p1698_p10 = scmp.ne.s32.totalorder %s2191_s2, %s1697_s23  ;;  %p1701_p11 = scmp.lt.u32.totalorder %s1697_s23, %s2191_s2 }
  0x39   :  { %p1703_p12 = pnand %p1701_p11, %p1698_p10 }
  0x3b   :  { %1706 = shalt.err (!%p1703_p12)
}
  0x3c   :  { %s1707_s28 = scalar_lea.vmem %s1910_s27, 128  ;;  %p1712_p0 = scmp.lt.s32.totalorder %s1910_s27, %s1910_s27 }
  0x3d   :  { %p1708_p13 = scmp.ne.s32.totalorder %s1910_s27, %s1707_s28  ;;  %p1713_p1 = scmp.lt.s32.totalorder %s1707_s28, %s1707_s28 }
  0x3f   :  { %p1714_p2 = por %p1713_p1, %p1712_p0 }
  0x41   :  { %p1715_p3 = pnand %p1714_p2, %p1708_p13 }
  0x43   :  { %1718 = shalt.err (!%p1715_p3)
}
  0x44   :  { %56 = dma.hbm_to_vmem [thread:$0]  %s2191_s2, 128, %s1910_s27, [#allocation6], %s1797_s29, %s1797_s29, %s1798_s30  }
  0x45   :  { %s1801_s12 = smov [#allocation10]   ;;  %s1802_s14 = smov [#allocation11]  }
  0x46   :  { %s80_s13 = sshll.u32 %s1801_s12, 4  ;;  %s93_s15 = sshll.u32 %s1802_s14, 4  ;;  %s81_s13 = int_to_ptr.vmem [resolvable:$true] %s80_s13  ;;  %s94_s15 = int_to_ptr.vmem [resolvable:$true] %s93_s15 }
  0x47   :  { %s1719_s3 = scalar_lea.hbm %s2196_s7, 256 }
  0x48   :  { %p1720_p4 = scmp.ne.s32.totalorder %s2196_s7, %s1719_s3  ;;  %p1723_p5 = scmp.lt.u32.totalorder %s1719_s3, %s2196_s7 }
  0x4a   :  { %p1725_p6 = pnand %p1723_p5, %p1720_p4 }
  0x4c   :  { %1728 = shalt.err (!%p1725_p6)
}
  0x4d   :  { %s1729_s2 = scalar_lea.vmem %s81_s13, 256  ;;  %p1734_p8 = scmp.lt.s32.totalorder %s81_s13, %s81_s13 }
  0x4e   :  { %p1730_p7 = scmp.ne.s32.totalorder %s81_s13, %s1729_s2  ;;  %p1735_p9 = scmp.lt.s32.totalorder %s1729_s2, %s1729_s2 }
  0x50   :  { %p1736_p10 = por %p1735_p9, %p1734_p8 }
  0x52   :  { %p1737_p11 = pnand %p1736_p10, %p1730_p7 }
  0x54   :  { %1740 = shalt.err (!%p1737_p11)
}
  0x55   :  { %86 = dma.hbm_to_vmem [thread:$0]  %s2196_s7, 256, %s81_s13, [#allocation9], %s1797_s29, %s1797_s29, %s1798_s30  }
  0x56   :  { %s1741_s24 = scalar_lea.hbm %s2197_s8, 16 }
  0x57   :  { %p1742_p12 = scmp.ne.s32.totalorder %s2197_s8, %s1741_s24  ;;  %p1745_p13 = scmp.lt.u32.totalorder %s1741_s24, %s2197_s8 }
  0x59   :  { %p1747_p0 = pnand %p1745_p13, %p1742_p12 }
  0x5b   :  { %1750 = shalt.err (!%p1747_p0)
}
  0x5c   :  { %s1751_s12 = scalar_lea.vmem %s94_s15, 16  ;;  %s1755_s14 = scalar_lea.vmem %s94_s15, 32 }
  0x5d   :  { %p1752_p1 = scmp.ne.s32.totalorder %s94_s15, %s1751_s12  ;;  %p1756_p2 = scmp.lt.s32.totalorder %s94_s15, %s94_s15 }
  0x5e   :  { %p1757_p3 = scmp.lt.s32.totalorder %s1755_s14, %s1751_s12 }
  0x60   :  { %p1758_p4 = por %p1757_p3, %p1756_p2 }
  0x62   :  { %p1759_p5 = pnand %p1758_p4, %p1752_p1 }
  0x64   :  { %1762 = shalt.err (!%p1759_p5)
}
  0x65   :  { %96 = dma.hbm_to_vmem [thread:$0]  %s2197_s8, 16, %s94_s15, [#allocation12]  }
  0x66   :  { %1785 = dma.done.wait [#allocation3], 128  }
  0x67   :  { %1786 = vsyncadd [#allocation3], 4294967168 }
  0x68   :  { %1787 = dma.done.wait [#allocation6], 256  }
  0x69   :  { %1788 = vsyncadd [#allocation6], 4294967040 }
  0x6a   :  { %1789 = dma.done.wait [#allocation9], 512  }
  0x6b   :  { %1790 = vsyncadd [#allocation9], 4294966784 }
  0x6c   :  { %1791 = dma.done.wait [#allocation12], 16  }
  0x6d   :  { %1792 = vsyncadd [#allocation12], 4294967280  ;;  %v1803_v0 = vmov 0.0   ;;  %vm1804_vm0 = vmmov 0   ;;  %v1588_v1 = vld [vmem:[%s2194_s5] sm:$0xff]   ;;  %v1589_v2 = vld [vmem:[#allocation8] sm:$0xff]  }
  0x6e   :  { %1435 = vmatprep.subr.bf16.mxu1 %v1803_v0  ;;  %1427 = vmatprep.subr.bf16.mxu0 %v1803_v0  ;;  %v1590_v3 = vld [vmem:[%s2194_s5 + $0x8] sm:$0xff]   ;;  %v1592_v4 = vld [vmem:[#allocation8 + $0x8] sm:$0xff]   ;;  %vm150_vm1 = vcmask 261120   ;;  %vm346_vm2 = vcmask 64512   ;;  %s1805_s20 = smov 112   ;;  %v1595_v27 = vld [vmem:[#allocation10 + $0x8] sm:$0xff]  }
  0x6f   :  { %1439 = vmatprep.mubr.msk.bf16.mxu1 %vm1804_vm0, %v1803_v0  ;;  %1431 = vmatprep.mubr.msk.bf16.mxu0 %vm1804_vm0, %v1803_v0  ;;  %v1591_v5 = vld [vmem:[#allocation5] sm:$0xff]   ;;  %v1593_v6 = vld [vmem:[#allocation2] sm:$0xff]   ;;  %v1596_v28 = vld [vmem:[#allocation7] sm:$0xff]   ;;  %vm408_vm3 = vcmask 1043456   ;;  %s1808_s22 = smov 8   ;;  %s1809_s23 = smov 16  }
  0x70   :  { %1436 = vmatpush3.bf16.msra.mxu1 %v1588_v1  ;;  %1428 = vmatpush3.bf16.msra.mxu0 %v1589_v2  ;;  %v1353_v7 = vld [vmem:[%s2195_s6] ss:$0 sm:$0xff]  ;;  %s1806_s6 = smov 120   ;;  %v1594_v26 = vld [vmem:[#allocation10] sm:$0xff]   ;;  %s1810_s1 = smov 24   ;;  %vm798_vm4 = vcmask 130048  }
  0x71   :  { %1437 = vmatprep.subr.bf16.mxu1 %v1803_v0  ;;  %1429 = vmatprep.subr.bf16.mxu0 %v1803_v0  ;;  %v1348_v8 = vld [vmem:[%s2193_s4] ss:$0 sm:$0xff]  ;;  %s1807_s4 = smov 104   ;;  %vm800_vm5 = vcmask 195584   ;;  %vm1325_vm6 = vcmask 523264   ;;  %s1811_s24 = smov [#allocation13]  }
  0x72   :  { %s1333_s26 = sshll.u32 %s1811_s24, 4  ;;  %s1334_s26 = int_to_ptr.vmem [resolvable:$true] %s1333_s26 }
  0x73   :  { %s1763_s28 = scalar_lea.vmem %s1334_s26, 256  ;;  %p1768_p7 = scmp.lt.s32.totalorder %s1334_s26, %s1334_s26 }
  0x74   :  { %1438 = vmatpush3.bf16.msra.mxu1 %v1590_v3  ;;  %1430 = vmatpush3.bf16.msra.mxu0 %v1592_v4  ;;  %p1764_p6 = scmp.ne.s32.totalorder %s1334_s26, %s1763_s28  ;;  %p1769_p8 = scmp.lt.s32.totalorder %s1763_s28, %s1763_s28 }
  0x75   :  { %1451 = vmatprep.subr.bf16.mxu1 %v1803_v0  ;;  %1443 = vmatprep.subr.bf16.mxu0 %v1803_v0 }
  0x76   :  { %p1770_p9 = por %p1769_p8, %p1768_p7 }
  0x77   :  { %1440 = vmatmul.mubr.msk.bf16.vlgmr.msra.gmra.mrb[0].mxu1 %vm150_vm1, %v1591_v5  ;;  %1432 = vmatmul.mubr.msk.bf16.vlgmr.msra.gmra.mrb[0].mxu0 %vm150_vm1, %v1593_v6 }
  0x78   :  { %1453 = vmatprep.mubr.msk.bf16.mxu1 %vm1804_vm0, %v1803_v0  ;;  %1447 = vmatprep.mubr.msk.bf16.mxu0 %vm1804_vm0, %v1803_v0  ;;  %p1771_p10 = pnand %p1770_p9, %p1764_p6 }
  0x79   :  { %1444 = vmatpush3.bf16.msra.mxu0 %v1594_v26 }
  0x7a   :  { %1445 = vmatprep.subr.bf16.mxu0 %v1803_v0 }
  0x7d   :  { %1446 = vmatpush3.bf16.msra.mxu0 %v1595_v27 }
  0x7e   :  { %1457 = vmatprep.subr.bf16.mxu0 %v1803_v0 }
  0x80   :  { %1448 = vmatmul.mubr.msk.bf16.vlgmr.msra.gmra.mrb[4].mxu0 %vm150_vm1, %v1596_v28 }
  0x81   :  { %1459 = vmatprep.mubr.msk.bf16.mxu0 %vm1804_vm0, %v1803_v0 }
 0x14a   :  { %v262_v9 = vpop.f32.mrb[0].mxu1  ;;  %v188_v12 = vpop.f32.mrb[0].mxu0 }
 0x14b   :  { %v263_v10 = vadd.f32 %v1353_v7, %v262_v9  ;;  %v1441_v11 = vpop.f32.mrb[1].mxu1  ;;  %v189_v14 = vadd.f32 %v1348_v8, %v188_v12  ;;  %v1433_v15 = vpop.f32.mrb[1].mxu0 }
 0x14c   :  { %v265_v13 = vpop.f32.mrb[2].mxu1  ;;  %v191_v18 = vpop.f32.mrb[2].mxu0 }
 0x14d   :  { %v344_v16 = vpack.c.bf16 %v263_v10, %v263_v10  ;;  %v1442_v17 = vpop.f32.mrb[3].mxu1  ;;  %v1434_v19 = vpop.f32.mrb[3].mxu0  ;;  %v343_v20 = vpack.c.bf16 %v189_v14, %v189_v14  ;;  %v266_v22 = vadd.f32 %v1353_v7, %v265_v13  ;;  %v192_v23 = vadd.f32 %v1348_v8, %v191_v18 }
 0x14f   :  { %567 = vrot.lane.b32.xlu1 %v344_v16, %s1805_s20  ;;  %456 = vrot.lane.b32.xlu0 %v344_v16, %s1806_s6  ;;  %v351_v21 = vsel %vm346_vm2, %v344_v16, 0  ;;  %v803_v24 = vpack.c.bf16 %v266_v22, %v266_v22  ;;  %v802_v25 = vpack.c.bf16 %v192_v23, %v192_v23 }
 0x150   :  { %1452 = vmatpush3.bf16.xpose.msra.mxu1 %v351_v21 }
 0x151   :  { %1463 = vmatprep.subr.bf16.mxu1 %v1803_v0  ;;  %v809_v38 = vsel %vm346_vm2, %v803_v24, 0 }
 0x153   :  { %565 = vrot.lane.b32.xlu1 %v343_v20, %s1805_s20  ;;  %453 = vrot.lane.b32.xlu0 %v343_v20, %s1806_s6 }
 0x157   :  { %675 = vrot.lane.b32.xlu1 %v343_v20, %s1807_s4  ;;  %677 = vrot.lane.b32.xlu0 %v344_v16, %s1807_s4 }
 0x158   :  { %1454 = vmatmul.mubr.msk.bf16.vlgmr.msra.gmra.mrb[4].mxu1 %vm346_vm2, %v343_v20 }
 0x159   :  { %1465 = vmatprep.mubr.msk.bf16.mxu1 %vm1804_vm0, %v1803_v0 }
 0x15b   :  { %913 = vrot.lane.b32.xlu0 %v803_v24, %s1806_s6  ;;  %910 = vrot.lane.b32.xlu1 %v802_v25, %s1806_s6 }
 0x15f   :  { %1024 = vrot.lane.b32.xlu0 %v803_v24, %s1805_s20  ;;  %1022 = vrot.lane.b32.xlu1 %v802_v25, %s1805_s20 }
 0x163   :  { %1134 = vrot.lane.b32.xlu0 %v803_v24, %s1807_s4  ;;  %1132 = vrot.lane.b32.xlu1 %v802_v25, %s1807_s4 }
 0x1c1   :  { %v457_v29 = vpop.permute.xlu0 %456  ;;  %v568_v31 = vpop.permute.xlu1 %567 }
 0x1c2   :  { %v462_v30 = vsel %vm346_vm2, %v457_v29, 0  ;;  %v573_v33 = vsel %vm346_vm2, %v568_v31, 0  ;;  %v336_v29 = vpop.f32.mrb[4].mxu0 }
 0x1c3   :  { %1464 = vmatpush3.bf16.xpose.msra.mxu1 %v462_v30  ;;  %v1449_v31 = vpop.f32.mrb[5].mxu0 }
 0x1c4   :  { %1475 = vmatprep.subr.bf16.mxu1 %v1803_v0 }
 0x1c5   :  { %v454_v32 = vpop.permute.xlu0 %453  ;;  %v566_v35 = vpop.permute.xlu1 %565 }
 0x1c9   :  { %v678_v34 = vpop.permute.xlu0 %677  ;;  %v676_v37 = vpop.permute.xlu1 %675 }
 0x1ca   :  { %1466 = vmatmul.mubr.msk.bf16.vlgmr.msra.gmra.mrb[8].mxu1 %vm346_vm2, %v454_v32  ;;  %v683_v36 = vsel %vm346_vm2, %v678_v34, 0  ;;  %v1358_v32 = vld [vmem:[#allocation11] ss:$0 sm:$0xff] }
 0x1cb   :  { %1476 = vmatpush3.bf16.xpose.msra.mxu1 %v573_v33  ;;  %1477 = vmatprep.mubr.msk.bf16.mxu1 %vm1804_vm0, %v1803_v0  ;;  %v339_v33 = vpop.f32.mrb[6].mxu0  ;;  %v337_v34 = vadd.f32 %v1358_v32, %v336_v29 }
 0x1cc   :  { %1487 = vmatprep.subr.bf16.mxu1 %v1803_v0 }
 0x1cd   :  { %v914_v39 = vpop.permute.xlu0 %913  ;;  %v911_v42 = vpop.permute.xlu1 %910 }
 0x1ce   :  { %v919_v40 = vsel %vm346_vm2, %v914_v39, 0 }
 0x1d1   :  { %v1025_v41 = vpop.permute.xlu0 %1024  ;;  %v1023_v45 = vpop.permute.xlu1 %1022 }
 0x1d2   :  { %1478 = vmatmul.mubr.msk.bf16.vlgmr.msra.gmra.mrb[12].mxu1 %vm346_vm2, %v566_v35  ;;  %v1030_v43 = vsel %vm346_vm2, %v1025_v41, 0  ;;  %v2083_v35 = vadd.f32 %v1358_v32, %v339_v33 }
 0x1d3   :  { %1488 = vmatpush3.bf16.xpose.msra.mxu1 %v683_v36  ;;  %1489 = vmatprep.mubr.msk.bf16.mxu1 %vm1804_vm0, %v1803_v0  ;;  %v1450_v36 = vpop.f32.mrb[7].mxu0 }
 0x1d4   :  { %1499 = vmatprep.subr.bf16.mxu1 %v1803_v0 }
 0x1d5   :  { %v1135_v44 = vpop.permute.xlu0 %1134  ;;  %v1133_v47 = vpop.permute.xlu1 %1132 }
 0x1d6   :  { %v1140_v46 = vsel %vm346_vm2, %v1135_v44, 0 }
 0x1da   :  { %1490 = vmatmul.mubr.msk.bf16.vlgmr.msra.gmra.mrb[16].mxu1 %vm346_vm2, %v676_v37  ;;  %v345_v37 = vpack.c.bf16 %v337_v34, %v337_v34 }
 0x1db   :  { %1500 = vmatpush3.bf16.xpose.msra.mxu1 %v809_v38  ;;  %1501 = vmatprep.mubr.msk.bf16.mxu1 %vm1804_vm0, %v1803_v0 }
 0x1dc   :  { %1511 = vmatprep.subr.bf16.mxu1 %v1803_v0  ;;  %v410_v38 = vsel %vm408_vm3, %v345_v37, 0 }
 0x1dd   :  { %1458 = vmatpush3.bf16.msra.mxu0 %v410_v38 }
 0x1de   :  { %1469 = vmatprep.subr.bf16.mxu0 %v1803_v0 }
 0x1e2   :  { %1502 = vmatmul.mubr.msk.bf16.vlgmr.msra.gmra.mrb[20].mxu1 %vm346_vm2, %v802_v25 }
 0x1e3   :  { %1512 = vmatpush3.bf16.xpose.msra.mxu1 %v919_v40  ;;  %1513 = vmatprep.mubr.msk.bf16.mxu1 %vm1804_vm0, %v1803_v0 }
 0x1e4   :  { %1523 = vmatprep.subr.bf16.mxu1 %v1803_v0 }
 0x1ea   :  { %1514 = vmatmul.mubr.msk.bf16.vlgmr.msra.gmra.mrb[24].mxu1 %vm346_vm2, %v911_v42 }
 0x1eb   :  { %1524 = vmatpush3.bf16.xpose.msra.mxu1 %v1030_v43  ;;  %1525 = vmatprep.mubr.msk.bf16.mxu1 %vm1804_vm0, %v1803_v0 }
 0x1ec   :  { %1535 = vmatprep.subr.bf16.mxu1 %v1803_v0 }
 0x1f2   :  { %1526 = vmatmul.mubr.msk.bf16.vlgmr.msra.gmra.mrb[28].mxu1 %vm346_vm2, %v1023_v45 }
 0x1f3   :  { %1536 = vmatpush3.bf16.xpose.msra.mxu1 %v1140_v46  ;;  %1537 = vmatprep.mubr.msk.bf16.mxu1 %vm1804_vm0, %v1803_v0 }
 0x1f4   :  { %1547 = vmatprep.subr.bf16.mxu1 %v1803_v0 }
 0x1fa   :  { %1538 = vmatmul.mubr.msk.bf16.vlgmr.msra.gmra.mrb[32].mxu1 %vm346_vm2, %v1133_v47 }
 0x1fb   :  { %1551 = vmatprep.mubr.msk.bf16.mxu1 %vm1804_vm0, %v1803_v0 }
 0x22b   :  { %v387_v48 = vpop.f32.mrb[4].mxu1 }
 0x22c   :  { %v1455_v49 = vpop.f32.mrb[5].mxu1  ;;  %v393_v50 = vsel %vm346_vm2, %v387_v48, -inf }
 0x22d   :  { %394 = vmax.xlane.f32.xlu0 %v393_v50  ;;  %v390_v51 = vpop.f32.mrb[6].mxu1 }
 0x22e   :  { %v1456_v52 = vpop.f32.mrb[7].mxu1 }
 0x29d   :  { %v2060_v53 = vpop.f32.mrb[8].mxu1 }
 0x29e   :  { %v1467_v54 = vpop.f32.mrb[9].mxu1  ;;  %v504_v55 = vsel %vm346_vm2, %v2060_v53, -inf }
 0x29f   :  { %v501_v56 = vpop.f32.mrb[10].mxu1  ;;  %505 = vmax.xlane.f32.xlu1 %v504_v55 }
 0x2a0   :  { %v1468_v57 = vpop.f32.mrb[11].mxu1 }
 0x2a5   :  { %v609_v58 = vpop.f32.mrb[12].mxu1 }
 0x2a6   :  { %v1479_v59 = vpop.f32.mrb[13].mxu1  ;;  %v615_v60 = vsel %vm346_vm2, %v609_v58, -inf }
 0x2a7   :  { %616 = vmax.xlane.f32.xlu0 %v615_v60  ;;  %v612_v61 = vpop.f32.mrb[14].mxu1 }
 0x2a8   :  { %v1480_v62 = vpop.f32.mrb[15].mxu1 }
 0x2ad   :  { %v719_v63 = vpop.f32.mrb[16].mxu1 }
 0x2ae   :  { %v1491_v1 = vpop.f32.mrb[17].mxu1  ;;  %v725_v2 = vsel %vm346_vm2, %v719_v63, -inf }
 0x2af   :  { %726 = vmax.xlane.f32.xlu0 %v725_v2  ;;  %v722_v3 = vpop.f32.mrb[18].mxu1 }
 0x2b0   :  { %v1492_v4 = vpop.f32.mrb[19].mxu1 }
 0x2b5   :  { %v2066_v5 = vpop.f32.mrb[20].mxu1 }
 0x2b6   :  { %v1503_v6 = vpop.f32.mrb[21].mxu1  ;;  %v851_v7 = vsel %vm346_vm2, %v2066_v5, -inf }
 0x2b7   :  { %852 = vmax.xlane.f32.xlu1 %v851_v7  ;;  %v848_v8 = vpop.f32.mrb[22].mxu1 }
 0x2b8   :  { %v1504_v9 = vpop.f32.mrb[23].mxu1 }
 0x2ba   :  { %v395_v10 = vpop.xlane.xlu0 %394 }
 0x2bb   :  { %v396_v11 = vsub.f32 %v387_v48, %v395_v10 }
 0x2bd   :  { %v397_v12 = vmul.f32 1.442695, %v396_v11  ;;  %v2070_v13 = vpop.f32.mrb[24].mxu1 }
 0x2be   :  { %v1515_v14 = vpop.f32.mrb[25].mxu1  ;;  %v961_v15 = vsel %vm346_vm2, %v2070_v13, -inf }
 0x2bf   :  { %1599 = vpow2.f32 %v397_v12  ;;  %962 = vmax.xlane.f32.xlu0 %v961_v15  ;;  %v958_v16 = vpop.f32.mrb[26].mxu1  ;;  %v804_v15 = vpack.c.bf16 %v2083_v35, %v2083_v35 }
 0x2c0   :  { %v1516_v17 = vpop.f32.mrb[27].mxu1 }
 0x2c1   :  { %v867_v34 = vsel %vm408_vm3, %v804_v15, 0 }
 0x2c5   :  { %v2074_v18 = vpop.f32.mrb[28].mxu1 }
 0x2c6   :  { %v1527_v19 = vpop.f32.mrb[29].mxu1  ;;  %v1072_v20 = vsel %vm346_vm2, %v2074_v18, -inf }
 0x2c7   :  { %1073 = vmax.xlane.f32.xlu1 %v1072_v20  ;;  %v1069_v21 = vpop.f32.mrb[30].mxu1 }
 0x2c8   :  { %v1528_v22 = vpop.f32.mrb[31].mxu1 }
 0x2c9   :  { %v1600_v23 = vpop.eup %1599 }
 0x2ca   :  { %v399_v24 = vsel %vm346_vm2, %v1600_v23, 0.0 }
 0x2cb   :  { %400 = vadd.xlane.f32.xlu1 %v399_v24 }
 0x2cd   :  { %v2079_v25 = vpop.f32.mrb[32].mxu1 }
 0x2ce   :  { %v1539_v26 = vpop.f32.mrb[33].mxu1  ;;  %v1182_v27 = vsel %vm346_vm2, %v2079_v25, -inf }
 0x2cf   :  { %1183 = vmax.xlane.f32.xlu0 %v1182_v27  ;;  %v1179_v28 = vpop.f32.mrb[34].mxu1 }
 0x2d0   :  { %v1540_v30 = vpop.f32.mrb[35].mxu1 }
 0x32c   :  { %v506_v39 = vpop.xlane.xlu1 %505 }
 0x32d   :  { %v507_v40 = vsub.f32 %v2060_v53, %v506_v39 }
 0x32f   :  { %v508_v41 = vmul.f32 1.442695, %v507_v40 }
 0x331   :  { %1601 = vpow2.f32 %v508_v41 }
 0x334   :  { %v617_v42 = vpop.xlane.xlu0 %616 }
 0x335   :  { %v618_v43 = vsub.f32 %v609_v58, %v617_v42 }
 0x337   :  { %v619_v44 = vmul.f32 1.442695, %v618_v43 }
 0x339   :  { %1603 = vpow2.f32 %v619_v44 }
 0x33b   :  { %v1602_v45 = vpop.eup %1601 }
 0x33c   :  { %v727_v46 = vpop.xlane.xlu0 %726  ;;  %v510_v47 = vsel %vm346_vm2, %v1602_v45, 0.0 }
 0x33d   :  { %v728_v48 = vsub.f32 %v719_v63, %v727_v46  ;;  %511 = vadd.xlane.f32.xlu0 %v510_v47 }
 0x33f   :  { %v729_v49 = vmul.f32 1.442695, %v728_v48 }
 0x341   :  { %1605 = vpow2.f32 %v729_v49 }
 0x343   :  { %v2089_v50 = vpop.eup %1603 }
 0x344   :  { %v621_v51 = vsel %vm346_vm2, %v2089_v50, 0.0  ;;  %v853_v54 = vpop.xlane.xlu1 %852 }
 0x345   :  { %622 = vadd.xlane.f32.xlu1 %v621_v51  ;;  %v854_v60 = vsub.f32 %v2066_v5, %v853_v54 }
 0x347   :  { %v855_v63 = vmul.f32 1.442695, %v854_v60 }
 0x34b   :  { %v2093_v52 = vpop.eup %1605 }
 0x34c   :  { %v731_v53 = vsel %vm346_vm2, %v2093_v52, 0.0  ;;  %v963_v61 = vpop.xlane.xlu0 %962 }
 0x34d   :  { %732 = vadd.xlane.f32.xlu0 %v731_v53  ;;  %v964_v62 = vsub.f32 %v2070_v13, %v963_v61 }
 0x34f   :  { %v965_v3 = vmul.f32 1.442695, %v964_v62 }
 0x354   :  { %v1074_v55 = vpop.xlane.xlu1 %1073 }
 0x355   :  { %v1075_v1 = vsub.f32 %v2074_v18, %v1074_v55 }
 0x356   :  { %627 = vrot.lane.b32.xlu1 %v345_v37, %s1805_s20 }
 0x357   :  { %v1076_v4 = vmul.f32 1.442695, %v1075_v1 }
 0x358   :  { %v401_v56 = vpop.xlane.xlu1 %400 }
 0x359   :  { %1607 = vrcp.f32 %v401_v56 }
 0x35a   :  { %737 = vrot.lane.b32.xlu1 %v345_v37, %s1807_s4  ;;  %1609 = vpow2.f32 %v855_v63 }
 0x35b   :  { %1611 = vpow2.f32 %v965_v3 }
 0x35c   :  { %v1184_v2 = vpop.xlane.xlu0 %1183  ;;  %1613 = vpow2.f32 %v1076_v4 }
 0x35d   :  { %v1185_v6 = vsub.f32 %v2079_v25, %v1184_v2 }
 0x35f   :  { %v1186_v5 = vmul.f32 1.442695, %v1185_v6 }
 0x361   :  { %1615 = vpow2.f32 %v1186_v5 }
 0x363   :  { %517 = vrot.lane.b32.xlu0 %v345_v37, %s1806_s6  ;;  %v1608_v57 = vpop.eup %1607 }
 0x364   :  { %v403_v58 = vmul.f32 %v1608_v57, %v1600_v23  ;;  %v1610_v7 = vpop.eup %1609 }
 0x365   :  { %v2107_v8 = vpop.eup %1611  ;;  %v857_v9 = vsel %vm346_vm2, %v1610_v7, 0.0 }
 0x366   :  { %v404_v59 = vpack.c.bf16 %v403_v58, %v403_v58  ;;  %v2110_v10 = vpop.eup %1613  ;;  %v967_v11 = vsel %vm346_vm2, %v2107_v8, 0.0 }
 0x367   :  { %v1078_v12 = vsel %vm346_vm2, %v2110_v10, 0.0 }
 0x368   :  { %1460 = vmatmul.mubr.msk.bf16.vlgmr.msra.gmra.mrb[8].mxu0 %vm346_vm2, %v404_v59 }
 0x369   :  { %1471 = vmatprep.mubr.msk.bf16.mxu0 %vm1804_vm0, %v1803_v0 }
 0x36b   :  { %v2116_v13 = vpop.eup %1615 }
 0x36c   :  { %v1188_v14 = vsel %vm346_vm2, %v2116_v13, 0.0 }
 0x37e   :  { %858 = vadd.xlane.f32.xlu1 %v857_v9 }
 0x382   :  { %968 = vadd.xlane.f32.xlu1 %v967_v11  ;;  %1079 = vadd.xlane.f32.xlu0 %v1078_v12 }
 0x386   :  { %1189 = vadd.xlane.f32.xlu1 %v1188_v14 }
 0x397   :  { %1084 = vrot.lane.b32.xlu1 %v804_v15, %s1805_s20 }
 0x398   :  { %974 = vrot.lane.b32.xlu0 %v804_v15, %s1806_s6 }
 0x39c   :  { %1194 = vrot.lane.b32.xlu0 %v804_v15, %s1807_s4  ;;  %v1597_v15 = vld [vmem:[%s2198_s9] sm:$0xff]  }
 0x39d   :  { %1548 = vmatpush3.bf16.msra.mxu1 %v1597_v15 }
 0x39e   :  { %1549 = vmatprep.subr.bf16.mxu1 %v1803_v0 }
 0x3ca   :  { %v512_v16 = vpop.xlane.xlu0 %511 }
 0x3cb   :  { %1617 = vrcp.f32 %v512_v16 }
 0x3d2   :  { %v623_v17 = vpop.xlane.xlu1 %622 }
 0x3d3   :  { %1619 = vrcp.f32 %v623_v17 }
 0x3d5   :  { %v1618_v18 = vpop.eup %1617 }
 0x3d6   :  { %v514_v20 = vmul.f32 %v1618_v18, %v1602_v45  ;;  %v628_v23 = vpop.permute.xlu1 %627 }
 0x3d7   :  { %v633_v26 = vsel %vm408_vm3, %v628_v23, 0 }
 0x3d8   :  { %v515_v24 = vpack.c.bf16 %v514_v20, %v514_v20  ;;  %v1598_v20 = vld [vmem:[%s2198_s9 + $0x8] sm:$0xff]  }
 0x3d9   :  { %1550 = vmatpush3.bf16.msra.mxu1 %v1598_v20 }
 0x3da   :  { %v733_v19 = vpop.xlane.xlu0 %732  ;;  %v738_v28 = vpop.permute.xlu1 %737 }
 0x3db   :  { %1621 = vrcp.f32 %v733_v19  ;;  %v743_v31 = vsel %vm408_vm3, %v738_v28, 0 }
 0x3dd   :  { %v1620_v25 = vpop.eup %1619 }
 0x3de   :  { %v518_v21 = vpop.permute.xlu0 %517  ;;  %v625_v27 = vmul.f32 %v1620_v25, %v2089_v50 }
 0x3df   :  { %v523_v22 = vsel %vm408_vm3, %v518_v21, 0 }
 0x3e0   :  { %1470 = vmatpush3.bf16.msra.mxu0 %v523_v22  ;;  %v626_v29 = vpack.c.bf16 %v625_v27, %v625_v27 }
 0x3e1   :  { %1481 = vmatprep.subr.bf16.mxu0 %v1803_v0 }
 0x3e3   :  { %1472 = vmatmul.mubr.msk.bf16.vlgmr.msra.gmra.mrb[12].mxu0 %vm346_vm2, %v515_v24 }
 0x3e4   :  { %1482 = vmatpush3.bf16.msra.mxu0 %v633_v26  ;;  %1483 = vmatprep.mubr.msk.bf16.mxu0 %vm1804_vm0, %v1803_v0 }
 0x3e5   :  { %1493 = vmatprep.subr.bf16.mxu0 %v1803_v0  ;;  %v1622_v30 = vpop.eup %1621 }
 0x3e6   :  { %v735_v32 = vmul.f32 %v1622_v30, %v2093_v52 }
 0x3e8   :  { %v736_v33 = vpack.c.bf16 %v735_v32, %v735_v32 }
 0x3eb   :  { %1484 = vmatmul.mubr.msk.bf16.vlgmr.msra.gmra.mrb[16].mxu0 %vm346_vm2, %v626_v29 }
 0x3ec   :  { %1494 = vmatpush3.bf16.msra.mxu0 %v743_v31  ;;  %1495 = vmatprep.mubr.msk.bf16.mxu0 %vm1804_vm0, %v1803_v0 }
 0x3ed   :  { %1505 = vmatprep.subr.bf16.mxu0 %v1803_v0 }
 0x3f3   :  { %1496 = vmatmul.mubr.msk.bf16.vlgmr.msra.gmra.mrb[20].mxu0 %vm346_vm2, %v736_v33 }
 0x3f4   :  { %1506 = vmatpush3.bf16.msra.mxu0 %v867_v34  ;;  %1507 = vmatprep.mubr.msk.bf16.mxu0 %vm1804_vm0, %v1803_v0 }
 0x3f5   :  { %1517 = vmatprep.subr.bf16.mxu0 %v1803_v0 }
 0x40b   :  { %v859_v35 = vpop.xlane.xlu1 %858 }
 0x40c   :  { %1623 = vrcp.f32 %v859_v35 }
 0x40f   :  { %v969_v36 = vpop.xlane.xlu1 %968  ;;  %v1080_v37 = vpop.xlane.xlu0 %1079 }
 0x410   :  { %1625 = vrcp.f32 %v969_v36 }
 0x411   :  { %1627 = vrcp.f32 %v1080_v37 }
 0x413   :  { %v975_v40 = vpop.permute.xlu0 %974  ;;  %v1190_v43 = vpop.xlane.xlu1 %1189 }
 0x414   :  { %v980_v44 = vsel %vm408_vm3, %v975_v40, 0  ;;  %1629 = vrcp.f32 %v1190_v43 }
 0x416   :  { %v1624_v38 = vpop.eup %1623 }
 0x417   :  { %v861_v39 = vmul.f32 %v1624_v38, %v1610_v7  ;;  %v1085_v46 = vpop.permute.xlu1 %1084  ;;  %v1195_v51 = vpop.permute.xlu0 %1194 }
 0x418   :  { %v1090_v49 = vsel %vm408_vm3, %v1085_v46, 0  ;;  %v1200_v54 = vsel %vm408_vm3, %v1195_v51, 0  ;;  %v1379_v46 = vld [vmem:[%s2199_s10] ss:$0 sm:$0xff] }
 0x419   :  { %v862_v41 = vpack.c.bf16 %v861_v39, %v861_v39 }
 0x41a   :  { %v1626_v42 = vpop.eup %1625 }
 0x41b   :  { %1508 = vmatmul.mubr.msk.bf16.vlgmr.msra.gmra.mrb[24].mxu0 %vm346_vm2, %v862_v41  ;;  %v971_v45 = vmul.f32 %v1626_v42, %v2107_v8  ;;  %v1628_v48 = vpop.eup %1627 }
 0x41c   :  { %1518 = vmatpush3.bf16.msra.mxu0 %v980_v44  ;;  %1519 = vmatprep.mubr.msk.bf16.mxu0 %vm1804_vm0, %v1803_v0  ;;  %v1082_v50 = vmul.f32 %v1628_v48, %v2110_v10 }
 0x41d   :  { %1529 = vmatprep.subr.bf16.mxu0 %v1803_v0  ;;  %v972_v47 = vpack.c.bf16 %v971_v45, %v971_v45 }
 0x41e   :  { %v1083_v52 = vpack.c.bf16 %v1082_v50, %v1082_v50  ;;  %v1630_v53 = vpop.eup %1629 }
 0x41f   :  { %v1192_v55 = vmul.f32 %v1630_v53, %v2116_v13 }
 0x421   :  { %v1193_v56 = vpack.c.bf16 %v1192_v55, %v1192_v55 }
 0x423   :  { %1520 = vmatmul.mubr.msk.bf16.vlgmr.msra.gmra.mrb[28].mxu0 %vm346_vm2, %v972_v47 }
 0x424   :  { %1530 = vmatpush3.bf16.msra.mxu0 %v1090_v49  ;;  %1531 = vmatprep.mubr.msk.bf16.mxu0 %vm1804_vm0, %v1803_v0 }
 0x425   :  { %1541 = vmatprep.subr.bf16.mxu0 %v1803_v0 }
 0x42b   :  { %1532 = vmatmul.mubr.msk.bf16.vlgmr.msra.gmra.mrb[32].mxu0 %vm346_vm2, %v1083_v52 }
 0x42c   :  { %1542 = vmatpush3.bf16.msra.mxu0 %v1200_v54  ;;  %1543 = vmatprep.mubr.msk.bf16.mxu0 %vm1804_vm0, %v1803_v0 }
 0x433   :  { %1544 = vmatmul.mubr.msk.bf16.vlgmr.msra.gmra.mrb[36].mxu0 %vm346_vm2, %v1193_v56 }
 0x43b   :  { %v446_v57 = vpop.f32.mrb[8].mxu0 }
 0x43c   :  { %v1461_v58 = vpop.f32.mrb[9].mxu0 }
 0x43d   :  { %v449_v59 = vpop.f32.mrb[10].mxu0 }
 0x43e   :  { %v1462_v60 = vpop.f32.mrb[11].mxu0 }
 0x4b6   :  { %v559_v61 = vpop.f32.mrb[12].mxu0 }
 0x4b7   :  { %v1473_v62 = vpop.f32.mrb[13].mxu0 }
 0x4b8   :  { %v562_v63 = vpop.f32.mrb[14].mxu0 }
 0x4b9   :  { %v1474_v1 = vpop.f32.mrb[15].mxu0 }
 0x4be   :  { %v669_v2 = vpop.f32.mrb[16].mxu0 }
 0x4bf   :  { %v1485_v3 = vpop.f32.mrb[17].mxu0 }
 0x4c0   :  { %v672_v4 = vpop.f32.mrb[18].mxu0 }
 0x4c1   :  { %v1486_v6 = vpop.f32.mrb[19].mxu0 }
 0x4c6   :  { %v779_v5 = vpop.f32.mrb[20].mxu0 }
 0x4c7   :  { %v1497_v7 = vpop.f32.mrb[21].mxu0 }
 0x4c8   :  { %v782_v8 = vpop.f32.mrb[22].mxu0 }
 0x4c9   :  { %v1498_v9 = vpop.f32.mrb[23].mxu0 }
 0x4ee   :  { %v903_v10 = vpop.f32.mrb[24].mxu0 }
 0x4ef   :  { %v1509_v11 = vpop.f32.mrb[25].mxu0 }
 0x4f0   :  { %v906_v12 = vpop.f32.mrb[26].mxu0 }
 0x4f1   :  { %v1510_v13 = vpop.f32.mrb[27].mxu0 }
 0x4f6   :  { %v1016_v14 = vpop.f32.mrb[28].mxu0 }
 0x4f7   :  { %v1573_v16 = vpack.i.bf16 %v1016_v14, %v559_v61  ;;  %v1521_v17 = vpop.f32.mrb[29].mxu0 }
 0x4f8   :  { %v1019_v18 = vpop.f32.mrb[30].mxu0 }
 0x4f9   :  { %1574 = vrot.lane.b32.xlu0 %v1573_v16, %s1808_s22  ;;  %v1522_v19 = vpop.f32.mrb[31].mxu0 }
 0x4fe   :  { %v1126_v21 = vpop.f32.mrb[32].mxu0 }
 0x4ff   :  { %v1578_v22 = vpack.i.bf16 %v1126_v21, %v669_v2  ;;  %v1533_v23 = vpop.f32.mrb[33].mxu0 }
 0x500   :  { %v1129_v24 = vpop.f32.mrb[34].mxu0 }
 0x501   :  { %1579 = vrot.lane.b32.xlu1 %v1578_v22, %s1809_s23  ;;  %v1534_v25 = vpop.f32.mrb[35].mxu0 }
 0x506   :  { %v1236_v26 = vpop.f32.mrb[36].mxu0 }
 0x507   :  { %v1583_v27 = vpack.i.bf16 %v1236_v26, %v779_v5  ;;  %v1545_v28 = vpop.f32.mrb[37].mxu0 }
 0x508   :  { %v1239_v29 = vpop.f32.mrb[38].mxu0 }
 0x509   :  { %1584 = vrot.lane.b32.xlu0 %v1583_v27, %s1810_s1  ;;  %v1546_v30 = vpop.f32.mrb[39].mxu0 }
 0x56b   :  { %v1575_v0 = vpop.permute.xlu0 %1574 }
 0x56c   :  { %v1577_v32 = vunpack.i.h.bf16 %v1575_v0  ;;  %v1576_v33 = vunpack.i.l.bf16 %v1575_v0 }
 0x56e   :  { %v1254_v37 = vsel %vm346_vm2, %v903_v10, %v1577_v32  ;;  %v797_v38 = vsel %vm346_vm2, %v446_v57, %v1576_v33 }
 0x573   :  { %v1580_v31 = vpop.permute.xlu1 %1579 }
 0x574   :  { %v1582_v34 = vunpack.i.h.bf16 %v1580_v31  ;;  %v1581_v35 = vunpack.i.l.bf16 %v1580_v31 }
 0x576   :  { %v1255_v41 = vsel %vm798_vm4, %v1254_v37, %v1582_v34  ;;  %v799_v42 = vsel %vm798_vm4, %v797_v38, %v1581_v35 }
 0x57b   :  { %v1585_v36 = vpop.permute.xlu0 %1584 }
 0x57c   :  { %v1587_v39 = vunpack.i.h.bf16 %v1585_v36  ;;  %v1586_v40 = vunpack.i.l.bf16 %v1585_v36 }
 0x57e   :  { %v1256_v43 = vsel %vm800_vm5, %v1255_v41, %v1587_v39  ;;  %v801_v44 = vsel %vm800_vm5, %v799_v42, %v1586_v40 }
 0x57f   :  { %v1257_v45 = vpack.c.bf16 %v1256_v43, %v801_v44 }
 0x581   :  { %1552 = vmatmul.mubr.msk.bf16.vlgmr.msra.gmra.mrb[36].mxu1 %vm150_vm1, %v1257_v45 }
 0x654   :  { %v1318_v47 = vpop.f32.mrb[36].mxu1 }
 0x655   :  { %v1319_v48 = vadd.f32 %v1379_v46, %v1318_v47  ;;  %v1553_v49 = vpop.f32.mrb[37].mxu1 }
 0x656   :  { %v1321_v50 = vpop.f32.mrb[38].mxu1 }
 0x657   :  { %1326 = vst.msk [vmem:[#allocation13] sm:$0xff] %vm1325_vm6, %v1319_v48  ;;  %v1322_v51 = vadd.f32 %v1379_v46, %v1321_v50  ;;  %v1554_v52 = vpop.f32.mrb[39].mxu1 }
 0x659   :  { %1327 = vst.msk [vmem:[#allocation13 + $0x8] sm:$0xff] %vm1325_vm6, %v1322_v51 }
 0x65a   :  { %1774 = shalt.err (!%p1771_p10)
}
 0x65b   :  { %s1775_s25 = scalar_lea.hbm %s2200_s11, 256 }
 0x65c   :  { %p1776_p11 = scmp.ne.s32.totalorder %s2200_s11, %s1775_s25  ;;  %p1779_p12 = scmp.lt.u32.totalorder %s1775_s25, %s2200_s11 }
 0x65e   :  { %p1781_p13 = pnand %p1779_p12, %p1776_p11 }
 0x660   :  { %1784 = shalt.err (!%p1781_p13)
}
 0x661   :  { %s1812_s8 = smov 128  }
 0x662   :  { %1339 = dma.vmem_to_hbm [thread:$0]  %s1334_s26, 256, %s2200_s11, [#allocation4], %s1812_s8, %s1812_s8, %s1808_s22  }
 0x663   :  { %1793 = dma.done.wait [#allocation4], 256  }
 0x664   :  { %1794 = vsyncadd [#allocation4], 4294967040 }
 0x665   :  { %1343 = vsyncpa [#allocation3], 1 }
 0x666   :  { %1344 = vsyncpa [#allocation6], 1 }
 0x667   :  { %1345 = vsyncpa [#allocation9], 1 }
 0x668   :  { %1346 = vsyncpa [#allocation12], 1 }
 0x669   :  { %1347 = vsyncpa [#allocation4], 1 }

</bundles_post_ra>
